<compile_context>
chip_gen: v7x
topology: tpu7x:2x2x1
jax: 0.10.0
libtpu: 0.0.40
codegen_flags: <defaults>
</compile_context>

<pallas_src>
import jax
import jax.numpy as jnp
from jax.experimental import pallas as pl
from jax.experimental.pallas import tpu as pltpu


def _round_up(x, m):
    return pl.cdiv(x, m) * m


# ---------------------------------------------------------------------------
# Kernel
# ---------------------------------------------------------------------------
def qnet_kernel(x_ref, w1_ref, b1_ref, w2_ref, b2_ref, o_ref):
    # Hidden layer: bf16 MXU matmul, f32 accumulation, bias + ReLU in f32.
    x = x_ref[...].astype(jnp.bfloat16)
    h = jnp.dot(x, w1_ref[...], preferred_element_type=jnp.float32)
    h = jnp.maximum(h + b1_ref[...], 0.0)
    # Output layer: bf16 MXU matmul, f32 accumulation, bias in f32.
    y = jnp.dot(h.astype(jnp.bfloat16), w2_ref[...],
                preferred_element_type=jnp.float32)
    o_ref[...] = (y + b2_ref[...]).astype(o_ref.dtype)


# ---------------------------------------------------------------------------
# One-time parameter preparation (hoisted out of the per-call hot path).
# Call this at init / after every optimizer step, not per forward.
# ---------------------------------------------------------------------------
def prepare_qnet_params(w1, b1, w2, b2):
    """Pad hidden dim to 128 lanes and cast weights to bf16, once.

    w1: (in_dim, hidden), b1: (hidden,) or (1, hidden)
    w2: (hidden, out_dim), b2: (out_dim,) or (1, out_dim)
    Zero padding of the hidden dim is semantics-preserving: padded w1 columns
    are 0 -> padded h columns are relu(0+0)=0 -> padded w2 rows (0) contribute
    nothing to the output.
    """
    in_dim, hidden = w1.shape
    out_dim = w2.shape[1]
    hid_p = _round_up(hidden, 128)

    w1_p = jnp.zeros((in_dim, hid_p), jnp.bfloat16).at[:, :hidden].set(
        w1.astype(jnp.bfloat16))
    b1_p = jnp.zeros((1, hid_p), jnp.float32).at[:, :hidden].set(
        jnp.reshape(b1.astype(jnp.float32), (1, hidden)))
    w2_p = jnp.zeros((hid_p, out_dim), jnp.bfloat16).at[:hidden, :].set(
        w2.astype(jnp.bfloat16))
    b2_p = jnp.reshape(b2.astype(jnp.float32), (1, out_dim))
    return w1_p, b1_p, w2_p, b2_p


def _choose_batch_tile(B, block_b):
    """Batch tile: multiple of 8, <= block_b, and >=2 grid steps when possible
    (so the 'parallel' grid axis can shard across both v7x TensorCores)."""
    B8 = _round_up(B, 8)
    if B8 >= 16:
        half = _round_up(pl.cdiv(B8, 2), 8)   # split batch in (at least) two
        tb = min(block_b, half)
    else:
        tb = B8
    tb = _round_up(tb, 8)
    B_p = _round_up(B8, tb)
    return tb, B_p


# ---------------------------------------------------------------------------
# Forward wrapper
# ---------------------------------------------------------------------------
def qnet_forward(x, w1_p, b1_p, w2_p, b2_p, *, block_b=512):
    """Fused Linear->ReLU->Linear. x:(B, in_dim) f32; params from
    prepare_qnet_params (bf16 weights, hidden padded to 128)."""
    B, in_dim = x.shape
    hid_p = w1_p.shape[1]
    out_dim = w2_p.shape[1]
    assert w1_p.shape[0] == in_dim

    tb, B_p = _choose_batch_tile(B, block_b)

    # Only batch rows are padded (zero rows -> zero outputs, sliced off below),
    # and only when the batch is ragged w.r.t. the tile.
    if B_p != B:
        x_in = jnp.zeros((B_p, in_dim), x.dtype).at[:B, :].set(x)
    else:
        x_in = x

    grid = (B_p // tb,)

    # Advisory cost estimate in real (unpadded-feature) terms.
    hidden_real = hid_p  # upper bound; real hidden <= hid_p, advisory only
    flops = 2 * B * (in_dim * hidden_real + hidden_real * out_dim)
    bytes_accessed = (x.size * x.dtype.itemsize
                      + w1_p.size * 2 + w2_p.size * 2
                      + b1_p.size * 4 + b2_p.size * 4
                      + B * out_dim * 4)

    out_padded = pl.pallas_call(
        qnet_kernel,
        out_shape=jax.ShapeDtypeStruct((B_p, out_dim), jnp.float32),
        grid=grid,
        in_specs=[
            # Activations: tiled over batch; last block dim == full array dim
            # (no 128-padding of the feature axis).
            pl.BlockSpec((tb, in_dim), lambda i: (i, 0)),
            # Weights / biases: constant block index -> VMEM-resident.
            pl.BlockSpec((in_dim, hid_p), lambda i: (0, 0)),
            pl.BlockSpec((1, hid_p), lambda i: (0, 0)),
            pl.BlockSpec((hid_p, out_dim), lambda i: (0, 0)),
            pl.BlockSpec((1, out_dim), lambda i: (0, 0)),
        ],
        # Output at real width (out_dim); masked store is negligible here.
        out_specs=pl.BlockSpec((tb, out_dim), lambda i: (i, 0)),
        compiler_params=pltpu.CompilerParams(
            dimension_semantics=("parallel",),
        ),
        cost_estimate=pl.CostEstimate(
            flops=flops, transcendentals=0, bytes_accessed=bytes_accessed),
    )(x_in, w1_p, b1_p, w2_p, b2_p)

    return out_padded[:B] if B_p != B else out_padded


# ---------------------------------------------------------------------------
# Init / reference
# ---------------------------------------------------------------------------
def init_linear_params(key, in_features, out_features):
    # Mimic PyTorch nn.Linear default init: U(-1/sqrt(in), 1/sqrt(in)).
    kw, kb = jax.random.split(key)
    bound = 1.0 / jnp.sqrt(jnp.float32(in_features))
    w = jax.random.uniform(
        kw, (in_features, out_features), jnp.float32, minval=-bound, maxval=bound)
    b = jax.random.uniform(
        kb, (out_features,), jnp.float32, minval=-bound, maxval=bound)
    return w, b


def reference_forward(x, w1, b1, w2, b2):
    h = jnp.maximum(x @ w1 + b1[None, :], 0.0)
    return h @ w2 + b2[None, :]


if __name__ == "__main__":
    # Shapes consistent with Qnet(input_size, hidden_size, output_size).
    batch = 8
    input_size = 16
    hidden_size = 32
    output_size = 4

    key = jax.random.PRNGKey(0)
    kx, k1, k2 = jax.random.split(key, 3)

    x = jax.random.normal(kx, (batch, input_size), jnp.float32)
    w1, b1 = init_linear_params(k1, input_size, hidden_size)
    w2, b2 = init_linear_params(k2, hidden_size, output_size)

    # Parameter padding / bf16 cast done ONCE, outside the per-call hot path.
    params_p = prepare_qnet_params(w1, b1, w2, b2)
    params_p = jax.tree_util.tree_map(jax.block_until_ready, params_p)

    out = qnet_forward(x, *params_p)
    out = jax.block_until_ready(out)
    ref = reference_forward(x, w1, b1, w2, b2)
    assert out.shape == (batch, output_size)
    # bf16 matmul inputs with f32 accumulation -> relaxed tolerance vs f32 ref.
    assert jnp.allclose(out, ref, atol=5e-2, rtol=5e-2), "mismatch vs reference"

    # Exercise the multi-step (>=2 grid steps) + ragged-batch path.
    kx2 = jax.random.fold_in(kx, 1)
    x_big = jax.random.normal(kx2, (300, input_size), jnp.float32)
    out_big = jax.block_until_ready(qnet_forward(x_big, *params_p))
    ref_big = reference_forward(x_big, w1, b1, w2, b2)
    assert out_big.shape == (300, output_size)
    assert jnp.allclose(out_big, ref_big, atol=5e-2, rtol=5e-2), "mismatch (tiled)"

    print("KERNEL_OK")
</pallas_src>

<mosaic_0001>
module attributes {stable_mosaic.version = 11 : i64} {
  func.func @qnet_kernel(%arg0: i32, %arg1: memref<8x16xf32, #tpu.memory_space<vmem>>, %arg2: memref<16x128xbf16, #tpu.memory_space<vmem>>, %arg3: memref<1x128xf32, #tpu.memory_space<vmem>>, %arg4: memref<128x4xbf16, #tpu.memory_space<vmem>>, %arg5: memref<1x4xf32, #tpu.memory_space<vmem>>, %arg6: memref<8x4xf32, #tpu.memory_space<vmem>>) attributes {dimension_semantics = [#tpu.dimension_semantics<parallel>], iteration_bounds = array<i64: 1>, scalar_prefetch = 0 : i64, scratch_operands = 0 : i64, tpu.core_type = #tpu.core_type<tc>, window_params = [{transform_indices = @transform_0, window_bounds = array<i64: 8, 16>}, {pipeline_mode = #tpu.pipeline_mode<synchronous>, transform_indices = @transform_1, window_bounds = array<i64: 16, 128>}, {pipeline_mode = #tpu.pipeline_mode<synchronous>, transform_indices = @transform_2, window_bounds = array<i64: 1, 128>}, {pipeline_mode = #tpu.pipeline_mode<synchronous>, transform_indices = @transform_3, window_bounds = array<i64: 128, 4>}, {pipeline_mode = #tpu.pipeline_mode<synchronous>, transform_indices = @transform_4, window_bounds = array<i64: 1, 4>}, {transform_indices = @transform_5, window_bounds = array<i64: 8, 4>}]} {
    %c0 = arith.constant 0 : index
    %c0_0 = arith.constant 0 : index
    %0 = vector.load %arg1[%c0, %c0_0] : memref<8x16xf32, #tpu.memory_space<vmem>>, vector<8x16xf32>
    %1 = arith.truncf %0 : vector<8x16xf32> to vector<8x16xbf16>
    %c0_1 = arith.constant 0 : index
    %c0_2 = arith.constant 0 : index
    %2 = vector.load %arg2[%c0_1, %c0_2] : memref<16x128xbf16, #tpu.memory_space<vmem>>, vector<16x128xbf16>
    %cst = arith.constant dense<0.000000e+00> : vector<8x128xf32>
    %3 = tpu.matmul %1, %2, %cst {dimension_numbers = #tpu.dot_dimension_numbers<[1], [0], [0], [1], [0, 0, 1, 1], [], []>} : vector<8x16xbf16>, vector<16x128xbf16>, vector<8x128xf32> -> vector<8x128xf32>
    %c0_3 = arith.constant 0 : index
    %c0_4 = arith.constant 0 : index
    %4 = vector.load %arg3[%c0_3, %c0_4] : memref<1x128xf32, #tpu.memory_space<vmem>>, vector<1x128xf32>
    %5 = vector.broadcast %4 : vector<1x128xf32> to vector<8x128xf32>
    %6 = arith.addf %3, %5 : vector<8x128xf32>
    %cst_5 = arith.constant 0.000000e+00 : f32
    %7 = vector.broadcast %cst_5 : f32 to vector<8x128xf32>
    %8 = arith.maximumf %6, %7 : vector<8x128xf32>
    %9 = arith.truncf %8 : vector<8x128xf32> to vector<8x128xbf16>
    %c0_6 = arith.constant 0 : index
    %c0_7 = arith.constant 0 : index
    %10 = vector.load %arg4[%c0_6, %c0_7] : memref<128x4xbf16, #tpu.memory_space<vmem>>, vector<128x4xbf16>
    %cst_8 = arith.constant dense<0.000000e+00> : vector<8x4xf32>
    %11 = tpu.matmul %9, %10, %cst_8 {dimension_numbers = #tpu.dot_dimension_numbers<[1], [0], [0], [1], [0, 0, 1, 1], [], []>} : vector<8x128xbf16>, vector<128x4xbf16>, vector<8x4xf32> -> vector<8x4xf32>
    %c0_9 = arith.constant 0 : index
    %c0_10 = arith.constant 0 : index
    %12 = vector.load %arg5[%c0_9, %c0_10] : memref<1x4xf32, #tpu.memory_space<vmem>>, vector<1x4xf32>
    %13 = vector.broadcast %12 : vector<1x4xf32> to vector<8x4xf32>
    %14 = arith.addf %11, %13 : vector<8x4xf32>
    %c0_11 = arith.constant 0 : index
    %c0_12 = arith.constant 0 : index
    %15 = vector.load %arg6[%c0_11, %c0_12] : memref<8x4xf32, #tpu.memory_space<vmem>>, vector<8x4xf32>
    tpu.vector_store %arg6[%c0_11, %c0_12], %14 {strides = array<i32>} : memref<8x4xf32, #tpu.memory_space<vmem>>, vector<8x4xf32>,
    return
  }
  func.func @transform_0(%arg0: i32) -> (i32, i32) {
    %c0_i32 = arith.constant 0 : i32
    %c0_i32_0 = arith.constant 0 : i32
    return %arg0, %c0_i32 : i32, i32
  }
  func.func @transform_1(%arg0: i32) -> (i32, i32) {
    %c0_i32 = arith.constant 0 : i32
    %c0_i32_0 = arith.constant 0 : i32
    %c0_i32_1 = arith.constant 0 : i32
    return %c0_i32, %c0_i32_0 : i32, i32
  }
  func.func @transform_2(%arg0: i32) -> (i32, i32) {
    %c0_i32 = arith.constant 0 : i32
    %c0_i32_0 = arith.constant 0 : i32
    %c0_i32_1 = arith.constant 0 : i32
    return %c0_i32, %c0_i32_0 : i32, i32
  }
  func.func @transform_3(%arg0: i32) -> (i32, i32) {
    %c0_i32 = arith.constant 0 : i32
    %c0_i32_0 = arith.constant 0 : i32
    %c0_i32_1 = arith.constant 0 : i32
    return %c0_i32, %c0_i32_0 : i32, i32
  }
  func.func @transform_4(%arg0: i32) -> (i32, i32) {
    %c0_i32 = arith.constant 0 : i32
    %c0_i32_0 = arith.constant 0 : i32
    %c0_i32_1 = arith.constant 0 : i32
    return %c0_i32, %c0_i32_0 : i32, i32
  }
  func.func @transform_5(%arg0: i32) -> (i32, i32) {
    %c0_i32 = arith.constant 0 : i32
    %c0_i32_0 = arith.constant 0 : i32
    return %arg0, %c0_i32 : i32, i32
  }
}

</mosaic_0001>

<bundles_post_ra>
// kernel: tpu_custom_call.1
= control target key start
LH: loop header
LB: loop body
LE: loop exit
PB: predicated region body
PF: predicated region fallthrough
CT: control target
= control target key end

     0   :  { %v261_v0 = vmov 0.0   ;;  %vm262_vm0 = vmmov 0   ;;  %vm38_vm1 = vcmask 130048   ;;  %vm195_vm2 = vcmask 31744   ;;  %s332_s1 = inlined_call_operand.vmem [shape: bf16[16,128], index: 1, kind: input, shape index: {}]   ;;  %s333_s0 = inlined_call_operand.vmem [shape: f32[8,16], index: 0, kind: input, shape index: {}]   ;;  %s334_s3 = inlined_call_operand.vmem [shape: bf16[128,4], index: 3, kind: input, shape index: {}]   ;;  %s335_s2 = inlined_call_operand.vmem [shape: f32[1,128], index: 2, kind: input, shape index: {}]   ;;  %s336_s4 = inlined_call_operand.vmem [shape: f32[1,4], index: 4, kind: input, shape index: {}]   ;;  %s337_s5 = inlined_call_operand.vmem [shape: f32[8,4], index: 5, kind: output, shape index: {}]  }
   0x1   :  { %224 = vmatprep.subr.bf16.mxu0 %v261_v0  ;;  %v252_v1 = vld [vmem:[%s332_s1] sm:$0xff]   ;;  %226 = vmatprep.mubr.msk.bf16.mxu0 %vm262_vm0, %v261_v0  ;;  %v254_v5 = vld [vmem:[%s334_s3 + $0x8] sm:$0xff]   ;;  %v255_v6 = vld [vmem:[%s334_s3 + $0x10] sm:$0xff]  }
   0x2   :  { %v21_v2 = vld [vmem:[%s333_s0] sm:$0xff]  ;;  %230 = vmatprep.subr.bf16.mxu1 %v261_v0  ;;  %246 = vmatprep.mubr.msk.bf16.mxu1 %vm262_vm0, %v261_v0  ;;  %v256_v7 = vld [vmem:[%s334_s3 + $0x18] sm:$0xff]   ;;  %v258_v9 = vld [vmem:[%s334_s3 + $0x28] sm:$0xff]  }
   0x3   :  { %225 = vmatpush3.bf16.msra.mxu0 %v252_v1  ;;  %v22_v3 = vpack.c.bf16 %v21_v2, %v21_v2  ;;  %v253_v4 = vld [vmem:[%s334_s3] sm:$0xff]   ;;  %v259_v10 = vld [vmem:[%s334_s3 + $0x30] sm:$0xff]   ;;  %v260_v11 = vld [vmem:[%s334_s3 + $0x38] sm:$0xff]  }
   0x4   :  { %231 = vmatpush3.bf16.msra.mxu1 %v253_v4  ;;  %v257_v8 = vld [vmem:[%s334_s3 + $0x20] sm:$0xff]  }
   0x5   :  { %232 = vmatprep.subr.bf16.mxu1 %v261_v0  ;;  %v201_v12 = vld [vmem:[%s335_s2] ss:$0 sm:$0xff] }
   0x6   :  { %227 = vmatmul.mubr.msk.bf16.vlgmr.msra.gmra.mrb[0].mxu0 %vm38_vm1, %v22_v3  ;;  %v204_v20 = vld [vmem:[%s336_s4] ss:$0 sm:$0xff] }
   0x8   :  { %233 = vmatpush3.bf16.msra.mxu1 %v254_v5 }
   0x9   :  { %234 = vmatprep.subr.bf16.mxu1 %v261_v0 }
   0xc   :  { %235 = vmatpush3.bf16.msra.mxu1 %v255_v6 }
   0xd   :  { %236 = vmatprep.subr.bf16.mxu1 %v261_v0 }
  0x10   :  { %237 = vmatpush3.bf16.msra.mxu1 %v256_v7 }
  0x11   :  { %238 = vmatprep.subr.bf16.mxu1 %v261_v0 }
  0x14   :  { %239 = vmatpush3.bf16.msra.mxu1 %v257_v8 }
  0x15   :  { %240 = vmatprep.subr.bf16.mxu1 %v261_v0 }
  0x18   :  { %241 = vmatpush3.bf16.msra.mxu1 %v258_v9 }
  0x19   :  { %242 = vmatprep.subr.bf16.mxu1 %v261_v0 }
  0x1c   :  { %243 = vmatpush3.bf16.msra.mxu1 %v259_v10 }
  0x1d   :  { %244 = vmatprep.subr.bf16.mxu1 %v261_v0 }
  0x20   :  { %245 = vmatpush3.bf16.msra.mxu1 %v260_v11 }
  0xd9   :  { %v76_v13 = vpop.f32.mrb[0].mxu0 }
  0xda   :  { %v77_v14 = vadd.f32 %v201_v12, %v76_v13  ;;  %v228_v15 = vpop.f32.mrb[1].mxu0 }
  0xdb   :  { %v79_v16 = vpop.f32.mrb[2].mxu0 }
  0xdc   :  { %v82_v17 = vmax.f32 %v77_v14, 0.0  ;;  %v229_v18 = vpop.f32.mrb[3].mxu0 }
  0xde   :  { %v83_v19 = vpack.c.bf16 %v82_v17, %v82_v17 }
  0xe0   :  { %247 = vmatmul.mubr.bf16.vlgmr.msra.gmra.mrb[0].mxu1 %v83_v19 }
 0x1b3   :  { %v189_v21 = vpop.f32.mrb[0].mxu1 }
 0x1b4   :  { %v190_v22 = vadd.f32 %v204_v20, %v189_v21  ;;  %v248_v23 = vpop.f32.mrb[1].mxu1 }
 0x1b5   :  { %v192_v24 = vpop.f32.mrb[2].mxu1 }
 0x1b6   :  { %196 = vst.msk [vmem:[%s337_s5] sm:$0xff] %vm195_vm2, %v190_v22  ;;  %v249_v25 = vpop.f32.mrb[3].mxu1 }

</bundles_post_ra>
